<compile_context>
chip_gen: v5e
topology: v5e:2x2
jax: 0.10.0
libtpu: 0.0.40
codegen_flags: <defaults>
</compile_context>

<pallas_src>
import math
import functools

import jax
import jax.numpy as jnp
from jax import lax
from jax.experimental import pallas as pl
from jax.experimental.pallas import tpu as pltpu

_P = 128          # padded feature / hidden lane width
_IN_LANES = 8     # packed input/output lane width: [x_0..x_{ndim-1}, t, 0...]


# ----------------------------------------------------------------------------
# Kernel: full forward pass for one batch tile
# ----------------------------------------------------------------------------
def _score_mlp_kernel(two_log_sigma, inv_two_log_sigma, ndim, nlayers,
                      in_ref, aux_ref, w_ref, b_ref, o_ref):
    slab = in_ref[...]                                   # (Bq, 8)
    t = slab[:, ndim:ndim + 1]                           # (Bq, 1)

    # var = std^2 = (sigma^(2t) - 1) / (2 log sigma)
    var = (jnp.exp(two_log_sigma * t) - 1.0) * inv_two_log_sigma
    inv_std = lax.rsqrt(var)                             # EUP rsqrt
    inv_scale = lax.rsqrt(1.0 + var)                     # EUP rsqrt

    # Gaussian Fourier embedding via a single sin:
    #   lanes [0 (x lanes), sin(2*pi*w*t), cos(2*pi*w*t) = sin(.+pi/2), 0...]
    e = jnp.sin(t * aux_ref[0:1, :] + aux_ref[1:2, :])   # (Bq, 128) f32

    # Layer 1: Fourier part on the MXU (bf16 operands, f32 accumulate) ...
    h = (jnp.dot(e.astype(jnp.bfloat16), w_ref[0],
                 preferred_element_type=jnp.float32)
         + b_ref[0, :])
    # ... plus the x part as `ndim` exact-f32 broadcast FMAs (rank-1 updates).
    for d in range(ndim):
        h = h + (slab[:, d:d + 1] * inv_scale) * aux_ref[8 + d:9 + d, :]
    h = jnp.tanh(h)

    # Hidden layers: static unroll, bf16 MXU, f32 accumulate + bias + tanh.
    for i in range(1, nlayers - 1):
        h = jnp.tanh(
            jnp.dot(h.astype(jnp.bfloat16), w_ref[i],
                    preferred_element_type=jnp.float32)
            + b_ref[i, :])

    pred = (jnp.dot(h.astype(jnp.bfloat16), w_ref[nlayers - 1],
                    preferred_element_type=jnp.float32)
            + b_ref[nlayers - 1, :])
    out = pred * inv_std                                 # (Bq, 128) f32
    o_ref[...] = out[:, :_IN_LANES]                      # packed 8-lane output


# ----------------------------------------------------------------------------
# Parameter construction (deterministic, mirrors the torch module's shapes)
# ----------------------------------------------------------------------------
def init_params(key, ndim=2, nlayers=5, nhidden=50, time_embed_dim=10):
    half = time_embed_dim // 2
    keys = jax.random.split(key, 2 * nlayers + 1)
    # GaussianFourierProjection.W = randn(embed_dim // 2) * scale, scale = 1
    wF = jax.random.normal(keys[0], (half,), jnp.float32)

    dims = [time_embed_dim + ndim] + [nhidden] * (nlayers - 1) + [ndim]
    Ws, bs = [], []
    for i in range(nlayers):
        fan_in = dims[i]
        bound = 1.0 / math.sqrt(fan_in)
        W = jax.random.uniform(keys[1 + 2 * i], (fan_in, dims[i + 1]),
                               jnp.float32, -bound, bound)
        b = jax.random.uniform(keys[2 + 2 * i], (dims[i + 1],),
                               jnp.float32, -bound, bound)
        Ws.append(W)
        bs.append(b)
    return wF, Ws, bs


# ----------------------------------------------------------------------------
# Pure-JAX reference (for correctness check)
# ----------------------------------------------------------------------------
def reference_forward(x, t, wF, Ws, bs, sigma):
    log_sigma = math.log(sigma)
    std = jnp.sqrt((sigma ** (2.0 * t) - 1.0) / (2.0 * log_sigma))[:, None]
    t_proj = t[:, None] * wF[None, :] * 2.0 * math.pi
    t_embed = jnp.concatenate([jnp.sin(t_proj), jnp.cos(t_proj)], axis=-1)
    h = jnp.concatenate([x / jnp.sqrt(1.0 + std ** 2), t_embed], axis=1)
    for i, (W, b) in enumerate(zip(Ws, bs)):
        h = h @ W + b
        if i < len(Ws) - 1:
            h = jnp.tanh(h)
    return h / std


# ----------------------------------------------------------------------------
# Adaptive batch tiling
# ----------------------------------------------------------------------------
def _round_up(v, m):
    return ((v + m - 1) // m) * m


def _cdiv(a, b):
    return -(-a // b)


def _choose_batch_tiling(B, max_block=2048):
    rows = _round_up(max(B, 1), 8)
    n_tiles = max(1, _cdiv(rows, max_block))
    if rows >= 16:
        # Give v7x's two TensorCores tiles to work on; keep the grid even.
        n_tiles = max(n_tiles, 2)
        if n_tiles % 2:
            n_tiles += 1
    bq = _round_up(_cdiv(rows, n_tiles), 8)
    return bq, bq * n_tiles, n_tiles


# ----------------------------------------------------------------------------
# Wrapper: pack params into slabs and invoke the Pallas kernel
# ----------------------------------------------------------------------------
def score_model_time_pallas(x, t, wF, Ws, bs, sigma, *, max_block_batch=2048):
    B, ndim = x.shape
    half = wF.shape[0]
    nlayers = len(Ws)
    assert ndim + 1 <= _IN_LANES, "x lanes + t lane must fit the packed slab"
    assert ndim + 2 * half <= _P, "x + Fourier features must fit 128 lanes"

    Bq, Bp, n_tiles = _choose_batch_tiling(B, max_block_batch)

    # Packed (Bp, 8) input slab: lanes [x_0..x_{ndim-1}, t, 0...].  Padded
    # rows get t=1.0 so rsqrt(var) stays finite there (rows are sliced away).
    t_full = jnp.ones((Bp,), jnp.float32).at[:B].set(t.astype(jnp.float32))
    in_slab = jnp.zeros((Bp, _IN_LANES), jnp.float32)
    in_slab = in_slab.at[:B, :ndim].set(x.astype(jnp.float32))
    in_slab = in_slab.at[:, ndim].set(t_full)

    # aux slab (16, 128) f32:
    #   row 0     : 2*pi*wF duplicated on sin and cos lanes (0 on x lanes)
    #   row 1     : phase (pi/2 on the cos lanes)
    #   rows 8..  : first-layer weight rows for the x features (exact f32)
    w2pi = wF.astype(jnp.float32) * (2.0 * math.pi)
    aux = jnp.zeros((16, _P), jnp.float32)
    aux = aux.at[0, ndim:ndim + half].set(w2pi)
    aux = aux.at[0, ndim + half:ndim + 2 * half].set(w2pi)
    aux = aux.at[1, ndim + half:ndim + 2 * half].set(math.pi / 2.0)
    W0 = Ws[0].astype(jnp.float32)                      # (ndim + 2*half, nh)
    nh0 = W0.shape[1]
    aux = aux.at[8:8 + ndim, :nh0].set(W0[:ndim])

    # Layer-weight slab (Fourier rows of layer 0 + all later layers) -> bf16.
    W_all = jnp.zeros((nlayers, _P, _P), jnp.float32)
    W_all = W_all.at[0, ndim:ndim + 2 * half, :nh0].set(W0[ndim:])
    b_all = jnp.zeros((nlayers, _P), jnp.float32)
    b_all = b_all.at[0, :bs[0].shape[0]].set(bs[0].astype(jnp.float32))
    for i in range(1, nlayers):
        Wi = Ws[i].astype(jnp.float32)
        bi = bs[i].astype(jnp.float32)
        W_all = W_all.at[i, :Wi.shape[0], :Wi.shape[1]].set(Wi)
        b_all = b_all.at[i, :bi.shape[0]].set(bi)
    W_all = W_all.astype(jnp.bfloat16)                  # native MXU dtype

    kernel = functools.partial(
        _score_mlp_kernel,
        float(2.0 * math.log(sigma)),
        float(1.0 / (2.0 * math.log(sigma))),
        ndim, nlayers)

    cost = pl.CostEstimate(
        flops=2 * nlayers * Bp * _P * _P + 2 * ndim * Bp * _P,
        transcendentals=nlayers * Bp * _P,
        bytes_accessed=(2 * Bp * _IN_LANES * 4            # in + out slabs
                        + 16 * _P * 4                      # aux
                        + nlayers * _P * _P * 2            # bf16 weights
                        + nlayers * _P * 4))               # f32 biases

    out = pl.pallas_call(
        kernel,
        out_shape=jax.ShapeDtypeStruct((Bp, _IN_LANES), jnp.float32),
        grid=(n_tiles,),
        in_specs=[
            pl.BlockSpec((Bq, _IN_LANES), lambda i: (i, 0)),       # x/t slab
            pl.BlockSpec((16, _P), lambda i: (0, 0)),              # aux
            pl.BlockSpec((nlayers, _P, _P), lambda i: (0, 0, 0)),  # weights
            pl.BlockSpec((nlayers, _P), lambda i: (0, 0)),         # biases
        ],
        out_specs=pl.BlockSpec((Bq, _IN_LANES), lambda i: (i, 0)),
        compiler_params=pltpu.CompilerParams(
            dimension_semantics=("parallel",)),
        cost_estimate=cost,
    )(in_slab, aux, W_all, b_all)

    return out[:B, :ndim]


# ----------------------------------------------------------------------------
if __name__ == "__main__":
    key = jax.random.PRNGKey(0)
    kx, kt, kp, kx2, kt2 = jax.random.split(key, 5)

    ndim = 2
    sigma = 5.0
    nlayers, nhidden, time_embed_dim = 5, 50, 10

    wF, Ws, bs = init_params(kp, ndim=ndim, nlayers=nlayers,
                             nhidden=nhidden, time_embed_dim=time_embed_dim)

    # Tolerances account for bf16 MXU operands (f32 accumulation).
    RTOL, ATOL = 5e-2, 2e-2

    # --- small batch (single grid step) ---
    B = 8
    x = jax.random.normal(kx, (B, ndim), jnp.float32)
    # avoid t ~ 0 (marginal std -> 0 is numerically unstable, as in torch)
    t = jax.random.uniform(kt, (B,), jnp.float32, 0.1, 1.0)

    out = jax.block_until_ready(score_model_time_pallas(x, t, wF, Ws, bs, sigma))
    ref = reference_forward(x, t, wF, Ws, bs, sigma)
    assert out.shape == (B, ndim), out.shape
    assert jnp.allclose(out, ref, rtol=RTOL, atol=ATOL), (
        "mismatch", float(jnp.max(jnp.abs(out - ref))))

    # --- larger batch (exercises the multi-step parallel batch grid) ---
    B2 = 600
    x2 = jax.random.normal(kx2, (B2, ndim), jnp.float32)
    t2 = jax.random.uniform(kt2, (B2,), jnp.float32, 0.1, 1.0)
    out2 = jax.block_until_ready(
        score_model_time_pallas(x2, t2, wF, Ws, bs, sigma))
    ref2 = reference_forward(x2, t2, wF, Ws, bs, sigma)
    assert out2.shape == (B2, ndim), out2.shape
    assert jnp.allclose(out2, ref2, rtol=RTOL, atol=ATOL), (
        "mismatch (large batch)", float(jnp.max(jnp.abs(out2 - ref2))))

    print("KERNEL_OK")
</pallas_src>

<mosaic_0001>
module attributes {stable_mosaic.version = 11 : i64} {
  func.func @_score_mlp_kernel(%arg0: i32, %arg1: memref<8x8xf32, #tpu.memory_space<vmem>>, %arg2: memref<16x128xf32, #tpu.memory_space<vmem>>, %arg3: memref<5x128x128xbf16, #tpu.memory_space<vmem>>, %arg4: memref<5x128xf32, #tpu.memory_space<vmem>>, %arg5: memref<8x8xf32, #tpu.memory_space<vmem>>) attributes {dimension_semantics = [#tpu.dimension_semantics<parallel>], iteration_bounds = array<i64: 1>, scalar_prefetch = 0 : i64, scratch_operands = 0 : i64, tpu.core_type = #tpu.core_type<tc>, window_params = [{transform_indices = @transform_0, window_bounds = array<i64: 8, 8>}, {pipeline_mode = #tpu.pipeline_mode<synchronous>, transform_indices = @transform_1, window_bounds = array<i64: 16, 128>}, {pipeline_mode = #tpu.pipeline_mode<synchronous>, transform_indices = @transform_2, window_bounds = array<i64: 5, 128, 128>}, {pipeline_mode = #tpu.pipeline_mode<synchronous>, transform_indices = @transform_3, window_bounds = array<i64: 5, 128>}, {transform_indices = @transform_4, window_bounds = array<i64: 8, 8>}]} {
    %c0 = arith.constant 0 : index
    %c0_0 = arith.constant 0 : index
    %0 = vector.load %arg1[%c0, %c0_0] : memref<8x8xf32, #tpu.memory_space<vmem>>, vector<8x8xf32>
    %1 = vector.extract_strided_slice %0 {offsets = [0, 2], sizes = [8, 1], strides = [1, 1]} : vector<8x8xf32> to vector<8x1xf32>
    %cst = arith.constant 3.21887589 : f32
    %2 = vector.broadcast %cst : f32 to vector<8x1xf32>
    %3 = arith.mulf %2, %1 : vector<8x1xf32>
    %4 = math.exp %3 : vector<8x1xf32>
    %cst_1 = arith.constant 1.000000e+00 : f32
    %5 = vector.broadcast %cst_1 : f32 to vector<8x1xf32>
    %6 = arith.subf %4, %5 : vector<8x1xf32>
    %cst_2 = arith.constant 0.310667455 : f32
    %7 = vector.broadcast %cst_2 : f32 to vector<8x1xf32>
    %8 = arith.mulf %6, %7 : vector<8x1xf32>
    %9 = math.rsqrt %8 : vector<8x1xf32>
    %cst_3 = arith.constant 1.000000e+00 : f32
    %10 = vector.broadcast %cst_3 : f32 to vector<8x1xf32>
    %11 = arith.addf %10, %8 : vector<8x1xf32>
    %12 = math.rsqrt %11 : vector<8x1xf32>
    %c0_4 = arith.constant 0 : index
    %c0_5 = arith.constant 0 : index
    %13 = vector.load %arg2[%c0_4, %c0_5] : memref<16x128xf32, #tpu.memory_space<vmem>>, vector<1x128xf32>
    %14 = vector.broadcast %1 : vector<8x1xf32> to vector<8x128xf32>
    %15 = vector.broadcast %13 : vector<1x128xf32> to vector<8x128xf32>
    %16 = arith.mulf %14, %15 : vector<8x128xf32>
    %c1 = arith.constant 1 : index
    %c0_6 = arith.constant 0 : index
    %17 = vector.load %arg2[%c1, %c0_6] : memref<16x128xf32, #tpu.memory_space<vmem>>, vector<1x128xf32>
    %18 = vector.broadcast %17 : vector<1x128xf32> to vector<8x128xf32>
    %19 = arith.addf %16, %18 : vector<8x128xf32>
    %20 = math.sin %19 : vector<8x128xf32>
    %21 = arith.truncf %20 : vector<8x128xf32> to vector<8x128xbf16>
    %c0_7 = arith.constant 0 : index
    %c0_8 = arith.constant 0 : index
    %c0_9 = arith.constant 0 : index
    %22 = vector.load %arg3[%c0_7, %c0_8, %c0_9] : memref<5x128x128xbf16, #tpu.memory_space<vmem>>, vector<1x128x128xbf16>
    %23 = vector.shape_cast %22 : vector<1x128x128xbf16> to vector<128x128xbf16>
    %cst_10 = arith.constant dense<0.000000e+00> : vector<8x128xf32>
    %24 = tpu.matmul %21, %23, %cst_10 {dimension_numbers = #tpu.dot_dimension_numbers<[1], [0], [0], [1], [0, 0, 1, 1], [], []>} : vector<8x128xbf16>, vector<128x128xbf16>, vector<8x128xf32> -> vector<8x128xf32>
    %c0_11 = arith.constant 0 : index
    %c0_12 = arith.constant 0 : index
    %25 = vector.load %arg4[%c0_11, %c0_12] : memref<5x128xf32, #tpu.memory_space<vmem>>, vector<1x128xf32>
    %26 = vector.shape_cast %25 : vector<1x128xf32> to vector<128xf32>
    %27 = vector.shape_cast %26 : vector<128xf32> to vector<1x128xf32>
    %28 = vector.broadcast %27 : vector<1x128xf32> to vector<8x128xf32>
    %29 = arith.addf %24, %28 : vector<8x128xf32>
    %30 = vector.extract_strided_slice %0 {offsets = [0, 0], sizes = [8, 1], strides = [1, 1]} : vector<8x8xf32> to vector<8x1xf32>
    %31 = arith.mulf %30, %12 : vector<8x1xf32>
    %c8 = arith.constant 8 : index
    %c0_13 = arith.constant 0 : index
    %32 = vector.load %arg2[%c8, %c0_13] : memref<16x128xf32, #tpu.memory_space<vmem>>, vector<1x128xf32>
    %33 = vector.broadcast %31 : vector<8x1xf32> to vector<8x128xf32>
    %34 = vector.broadcast %32 : vector<1x128xf32> to vector<8x128xf32>
    %35 = arith.mulf %33, %34 : vector<8x128xf32>
    %36 = arith.addf %29, %35 : vector<8x128xf32>
    %37 = vector.extract_strided_slice %0 {offsets = [0, 1], sizes = [8, 1], strides = [1, 1]} : vector<8x8xf32> to vector<8x1xf32>
    %38 = arith.mulf %37, %12 : vector<8x1xf32>
    %c9 = arith.constant 9 : index
    %c0_14 = arith.constant 0 : index
    %39 = vector.load %arg2[%c9, %c0_14] : memref<16x128xf32, #tpu.memory_space<vmem>>, vector<1x128xf32>
    %40 = vector.broadcast %38 : vector<8x1xf32> to vector<8x128xf32>
    %41 = vector.broadcast %39 : vector<1x128xf32> to vector<8x128xf32>
    %42 = arith.mulf %40, %41 : vector<8x128xf32>
    %43 = arith.addf %36, %42 : vector<8x128xf32>
    %44 = math.tanh %43 : vector<8x128xf32>
    %45 = arith.truncf %44 : vector<8x128xf32> to vector<8x128xbf16>
    %c1_15 = arith.constant 1 : index
    %c0_16 = arith.constant 0 : index
    %c0_17 = arith.constant 0 : index
    %46 = vector.load %arg3[%c1_15, %c0_16, %c0_17] : memref<5x128x128xbf16, #tpu.memory_space<vmem>>, vector<1x128x128xbf16>
    %47 = vector.shape_cast %46 : vector<1x128x128xbf16> to vector<128x128xbf16>
    %cst_18 = arith.constant dense<0.000000e+00> : vector<8x128xf32>
    %48 = tpu.matmul %45, %47, %cst_18 {dimension_numbers = #tpu.dot_dimension_numbers<[1], [0], [0], [1], [0, 0, 1, 1], [], []>} : vector<8x128xbf16>, vector<128x128xbf16>, vector<8x128xf32> -> vector<8x128xf32>
    %c1_19 = arith.constant 1 : index
    %c0_20 = arith.constant 0 : index
    %49 = vector.load %arg4[%c1_19, %c0_20] : memref<5x128xf32, #tpu.memory_space<vmem>>, vector<1x128xf32>
    %50 = vector.shape_cast %49 : vector<1x128xf32> to vector<128xf32>
    %51 = vector.shape_cast %50 : vector<128xf32> to vector<1x128xf32>
    %52 = vector.broadcast %51 : vector<1x128xf32> to vector<8x128xf32>
    %53 = arith.addf %48, %52 : vector<8x128xf32>
    %54 = math.tanh %53 : vector<8x128xf32>
    %55 = arith.truncf %54 : vector<8x128xf32> to vector<8x128xbf16>
    %c2 = arith.constant 2 : index
    %c0_21 = arith.constant 0 : index
    %c0_22 = arith.constant 0 : index
    %56 = vector.load %arg3[%c2, %c0_21, %c0_22] : memref<5x128x128xbf16, #tpu.memory_space<vmem>>, vector<1x128x128xbf16>
    %57 = vector.shape_cast %56 : vector<1x128x128xbf16> to vector<128x128xbf16>
    %cst_23 = arith.constant dense<0.000000e+00> : vector<8x128xf32>
    %58 = tpu.matmul %55, %57, %cst_23 {dimension_numbers = #tpu.dot_dimension_numbers<[1], [0], [0], [1], [0, 0, 1, 1], [], []>} : vector<8x128xbf16>, vector<128x128xbf16>, vector<8x128xf32> -> vector<8x128xf32>
    %c2_24 = arith.constant 2 : index
    %c0_25 = arith.constant 0 : index
    %59 = vector.load %arg4[%c2_24, %c0_25] : memref<5x128xf32, #tpu.memory_space<vmem>>, vector<1x128xf32>
    %60 = vector.shape_cast %59 : vector<1x128xf32> to vector<128xf32>
    %61 = vector.shape_cast %60 : vector<128xf32> to vector<1x128xf32>
    %62 = vector.broadcast %61 : vector<1x128xf32> to vector<8x128xf32>
    %63 = arith.addf %58, %62 : vector<8x128xf32>
    %64 = math.tanh %63 : vector<8x128xf32>
    %65 = arith.truncf %64 : vector<8x128xf32> to vector<8x128xbf16>
    %c3 = arith.constant 3 : index
    %c0_26 = arith.constant 0 : index
    %c0_27 = arith.constant 0 : index
    %66 = vector.load %arg3[%c3, %c0_26, %c0_27] : memref<5x128x128xbf16, #tpu.memory_space<vmem>>, vector<1x128x128xbf16>
    %67 = vector.shape_cast %66 : vector<1x128x128xbf16> to vector<128x128xbf16>
    %cst_28 = arith.constant dense<0.000000e+00> : vector<8x128xf32>
    %68 = tpu.matmul %65, %67, %cst_28 {dimension_numbers = #tpu.dot_dimension_numbers<[1], [0], [0], [1], [0, 0, 1, 1], [], []>} : vector<8x128xbf16>, vector<128x128xbf16>, vector<8x128xf32> -> vector<8x128xf32>
    %c3_29 = arith.constant 3 : index
    %c0_30 = arith.constant 0 : index
    %69 = vector.load %arg4[%c3_29, %c0_30] : memref<5x128xf32, #tpu.memory_space<vmem>>, vector<1x128xf32>
    %70 = vector.shape_cast %69 : vector<1x128xf32> to vector<128xf32>
    %71 = vector.shape_cast %70 : vector<128xf32> to vector<1x128xf32>
    %72 = vector.broadcast %71 : vector<1x128xf32> to vector<8x128xf32>
    %73 = arith.addf %68, %72 : vector<8x128xf32>
    %74 = math.tanh %73 : vector<8x128xf32>
    %75 = arith.truncf %74 : vector<8x128xf32> to vector<8x128xbf16>
    %c4 = arith.constant 4 : index
    %c0_31 = arith.constant 0 : index
    %c0_32 = arith.constant 0 : index
    %76 = vector.load %arg3[%c4, %c0_31, %c0_32] : memref<5x128x128xbf16, #tpu.memory_space<vmem>>, vector<1x128x128xbf16>
    %77 = vector.shape_cast %76 : vector<1x128x128xbf16> to vector<128x128xbf16>
    %cst_33 = arith.constant dense<0.000000e+00> : vector<8x128xf32>
    %78 = tpu.matmul %75, %77, %cst_33 {dimension_numbers = #tpu.dot_dimension_numbers<[1], [0], [0], [1], [0, 0, 1, 1], [], []>} : vector<8x128xbf16>, vector<128x128xbf16>, vector<8x128xf32> -> vector<8x128xf32>
    %c4_34 = arith.constant 4 : index
    %c0_35 = arith.constant 0 : index
    %79 = vector.load %arg4[%c4_34, %c0_35] : memref<5x128xf32, #tpu.memory_space<vmem>>, vector<1x128xf32>
    %80 = vector.shape_cast %79 : vector<1x128xf32> to vector<128xf32>
    %81 = vector.shape_cast %80 : vector<128xf32> to vector<1x128xf32>
    %82 = vector.broadcast %81 : vector<1x128xf32> to vector<8x128xf32>
    %83 = arith.addf %78, %82 : vector<8x128xf32>
    %84 = vector.broadcast %9 : vector<8x1xf32> to vector<8x128xf32>
    %85 = arith.mulf %83, %84 : vector<8x128xf32>
    %86 = vector.extract_strided_slice %85 {offsets = [0, 0], sizes = [8, 8], strides = [1, 1]} : vector<8x128xf32> to vector<8x8xf32>
    %c0_36 = arith.constant 0 : index
    %c0_37 = arith.constant 0 : index
    %87 = vector.load %arg5[%c0_36, %c0_37] : memref<8x8xf32, #tpu.memory_space<vmem>>, vector<8x8xf32>
    tpu.vector_store %arg5[%c0_36, %c0_37], %86 {strides = array<i32>} : memref<8x8xf32, #tpu.memory_space<vmem>>, vector<8x8xf32>,
    return
  }
  func.func @transform_0(%arg0: i32) -> (i32, i32) {
    %c0_i32 = arith.constant 0 : i32
    %c0_i32_0 = arith.constant 0 : i32
    return %arg0, %c0_i32 : i32, i32
  }
  func.func @transform_1(%arg0: i32) -> (i32, i32) {
    %c0_i32 = arith.constant 0 : i32
    %c0_i32_0 = arith.constant 0 : i32
    %c0_i32_1 = arith.constant 0 : i32
    return %c0_i32, %c0_i32_0 : i32, i32
  }
  func.func @transform_2(%arg0: i32) -> (i32, i32, i32) {
    %c0_i32 = arith.constant 0 : i32
    %c0_i32_0 = arith.constant 0 : i32
    %c0_i32_1 = arith.constant 0 : i32
    %c0_i32_2 = arith.constant 0 : i32
    return %c0_i32, %c0_i32_0, %c0_i32_1 : i32, i32, i32
  }
  func.func @transform_3(%arg0: i32) -> (i32, i32) {
    %c0_i32 = arith.constant 0 : i32
    %c0_i32_0 = arith.constant 0 : i32
    %c0_i32_1 = arith.constant 0 : i32
    return %c0_i32, %c0_i32_0 : i32, i32
  }
  func.func @transform_4(%arg0: i32) -> (i32, i32) {
    %c0_i32 = arith.constant 0 : i32
    %c0_i32_0 = arith.constant 0 : i32
    return %arg0, %c0_i32 : i32, i32
  }
}

</mosaic_0001>

<bundles_post_ra>
// kernel: tpu_custom_call.1
= control target key start
LH: loop header
LB: loop body
LE: loop exit
PB: predicated region body
PF: predicated region fallthrough
CT: control target
= control target key end

     0   :  { %9 = vsyncpa [#allocation3], 0  ;;  %s1252_s0 = inlined_call_operand.hbm [shape: f32[8,8], index: 0, kind: input, shape index: {}]   ;;  %s1253_s1 = inlined_call_operand.hbm [shape: f32[16,128], index: 1, kind: input, shape index: {}]   ;;  %s1254_s2 = inlined_call_operand.hbm [shape: bf16[5,128,128], index: 2, kind: input, shape index: {}]   ;;  %s1255_s3 = inlined_call_operand.hbm [shape: f32[5,128], index: 3, kind: input, shape index: {}]   ;;  %s1256_s4 = inlined_call_operand.hbm [shape: f32[8,8], index: 4, kind: output, shape index: {}]  }
   0x1   :  { %10 = vsyncpa [#allocation6], 0 }
   0x2   :  { %11 = vsyncpa [#allocation9], 0  ;;  %s28_s17 = sshll.u32 %s1253_s1, 4  ;;  %s29_s17 = int_to_ptr.hbm [resolvable:$true] %s28_s17 }
   0x3   :  { %12 = vsyncpa [#allocation4], 0  ;;  %s1111_s18 = smov [#allocation5]   ;;  %s18_s22 = sshll.u32 %s1252_s0, 4  ;;  %s19_s22 = int_to_ptr.hbm [resolvable:$true] %s18_s22 }
   0x4   :  { %s30_s19 = sshll.u32 %s1111_s18, 4  ;;  %s1112_s23 = smov 128   ;;  %s31_s19 = int_to_ptr.vmem [resolvable:$true] %s30_s19 }
   0x5   :  { %s1113_s24 = smov 8   ;;  %s1114_s25 = smov [#allocation2]  }
   0x6   :  { %36 = dma.hbm_to_vmem [thread:$0]  %s29_s17, 256, %s31_s19, [#allocation6], %s1112_s23, %s1112_s23, %s1113_s24  }
   0x7   :  { %s20_s26 = sshll.u32 %s1114_s25, 4  ;;  %s41_s29 = sshll.u32 %s1254_s2, 4  ;;  %s21_s26 = int_to_ptr.vmem [resolvable:$true] %s20_s26  ;;  %s42_s29 = int_to_ptr.hbm [resolvable:$true] %s41_s29 }
   0x8   :  { %23 = dma.hbm_to_vmem [thread:$0]  %s19_s22, 128, %s21_s26, [#allocation3]  }
   0x9   :  { %s1115_s1 = smov [#allocation7]   ;;  %s55_s0 = sshll.u32 %s1255_s3, 4  ;;  %s56_s0 = int_to_ptr.hbm [resolvable:$true] %s55_s0 }
   0xa   :  { %s43_s30 = sshll.u32 %s1115_s1, 4  ;;  %s1116_s7 = smov 64   ;;  %s44_s30 = int_to_ptr.vmem [resolvable:$true] %s43_s30 }
   0xb   :  { %s1117_s8 = smov 4   ;;  %s1118_s9 = smov [#allocation8]  }
   0xc   :  { %49 = dma.hbm_to_vmem [thread:$0]  %s42_s29, 5120, %s44_s30, [#allocation6], %s1116_s7, %s1116_s7, %s1117_s8  }
   0xd   :  { %s57_s10 = sshll.u32 %s1118_s9, 4  ;;  %s58_s10 = int_to_ptr.vmem [resolvable:$true] %s57_s10 }
   0xe   :  { %60 = dma.hbm_to_vmem [thread:$0]  %s56_s0, 128, %s58_s10, [#allocation9]  }
   0xf   :  { %1103 = dma.done.wait [#allocation3], 128  }
  0x10   :  { %1104 = vsyncadd [#allocation3], 4294967168 }
  0x11   :  { %1105 = dma.done.wait [#allocation6], 5376  }
  0x12   :  { %1106 = vsyncadd [#allocation6], 4294961920 }
  0x13   :  { %1107 = dma.done.wait [#allocation9], 128  }
  0x14   :  { %1108 = vsyncadd [#allocation9], 4294967168  ;;  %v1119_v0 = vmov 2   ;;  %v1169_v1 = vld [vmem:[#allocation2] sm:$0xff]  ;;  %s1120_s2 = smov 126   ;;  %s1121_s3 = smov 127  }
  0x15   :  { %956 = vset.pattern.permute.xlu0 %v1119_v0  ;;  %v78_v2 = vmul.f32 3.218876, %v1169_v1  ;;  %v903_v15 = vld [vmem:[#allocation7 + $0x38] sm:$0xff]  ;;  %v902_v16 = vld [vmem:[#allocation7 + $0x30] sm:$0xff]  ;;  %v901_v18 = vld [vmem:[#allocation7 + $0x28] sm:$0xff]  ;;  %v1122_v23 = vmov 0  }
  0x16   :  { %107 = vperm.xlu0 %956, %v1169_v1   ;;  %337 = vmatpush.bf16.msra.mxu0 %v903_v15  ;;  %v960_v17 = vld [vmem:[#allocation5] ss:$0 sm:$0xff]  ;;  %v961_v19 = vld [vmem:[#allocation5 + $0x1] ss:$0 sm:$0xff]  ;;  %v900_v22 = vld [vmem:[#allocation7 + $0x20] sm:$0xff]  ;;  %s1130_s11 = smov [#allocation10]  }
  0x17   :  { %v79_v3 = vmul.f32 1.442695, %v78_v2  ;;  %957 = vset.pattern.permute.xlu1 %v1122_v23  ;;  %v899_v26 = vld [vmem:[#allocation7 + $0x18] sm:$0xff]  ;;  %v898_v29 = vld [vmem:[#allocation7 + $0x10] sm:$0xff]  ;;  %v897_v32 = vld [vmem:[#allocation7 + $0x8] sm:$0xff]  ;;  %s718_s12 = sshll.u32 %s1130_s11, 4  ;;  %s719_s12 = int_to_ptr.vmem [resolvable:$true] %s718_s12 }
  0x18   :  { %v896_v37 = vld [vmem:[#allocation7] sm:$0xff]  ;;  %v1123_v40 = vmov 2102212464   ;;  %v1124_v42 = vmov 920167782   ;;  %s720_s15 = sshll.u32 %s1256_s4, 4  ;;  %s721_s15 = int_to_ptr.hbm [resolvable:$true] %s720_s15 }
  0x19   :  { %969 = vpow2.f32 %v79_v3  ;;  %v1125_v45 = vmov 1326507024   ;;  %v1126_v47 = vmov 683565275   ;;  %v1127_v49 = vmov 2475754826  }
  0x1a   :  { %338 = vmatpush.bf16.msra.mxu0 %v902_v16  ;;  %v1128_v52 = vmov 2131351028  }
  0x1e   :  { %339 = vmatpush.bf16.msra.mxu0 %v901_v18 }
  0x1f   :  { %v970_v4 = vpop.eup %969 }
  0x20   :  { %v732_v5 = vadd.f32 -1.0, %v970_v4 }
  0x22   :  { %v1173_v6 = vmul.f32 0.31066746, %v732_v5  ;;  %340 = vmatpush.bf16.msra.mxu0 %v900_v22 }
  0x24   :  { %v93_v7 = vadd.f32 1.0, %v1173_v6 }
  0x26   :  { %971 = vrsqrt.f32 %v93_v7  ;;  %vm100_vm0 = vweird.f32 %v93_v7  ;;  %341 = vmatpush.bf16.msra.mxu0 %v899_v26 }
  0x2a   :  { %342 = vmatpush.bf16.msra.mxu0 %v898_v29 }
  0x2c   :  { %v972_v8 = vpop.eup %971 }
  0x2d   :  { %v95_v9 = vmul.f32 %v972_v8, %v93_v7  ;;  %vm101_vm1 = vweird.f32 %v972_v8 }
  0x2e   :  { %vm102_vm2 = vmor %vm100_vm0, %vm101_vm1  ;;  %343 = vmatpush.bf16.msra.mxu0 %v897_v32 }
  0x2f   :  { %v96_v10 = vmul.f32 %v972_v8, %v95_v9 }
  0x31   :  { %v97_v11 = vmul.f32 0.5, %v96_v10 }
  0x32   :  { %344 = vmatpush.bf16.msra.mxu0 %v896_v37 }
  0x33   :  { %v98_v12 = vsub.f32 1.5, %v97_v11 }
  0x35   :  { %v99_v13 = vmul.f32 %v972_v8, %v98_v12 }
  0x37   :  { %v103_v14 = vsel %vm102_vm2, %v972_v8, %v99_v13 }
  0x38   :  { %351 = vrot.lane.b32.xlu0 %v103_v14, %s1120_s2  ;;  %364 = vrot.lane.b32.xlu1 %v103_v14, %s1121_s3 }
  0x88   :  { %v108_v20 = vpop.permute.xlu0 %107 }
  0x89   :  { %v111_v21 = vmul.f32 %v960_v17, %v108_v20 }
  0x8b   :  { %v1177_v24 = vadd.f32 %v961_v19, %v111_v21 }
  0x8d   :  { %v118_v25 = vand.u32 2139095040, %v1177_v24  ;;  %v115_v30 = vand.u32 2147483647, %v1177_v24  ;;  %vm117_vm15 = vcmp.lt.s32.totalorder %v1177_v24, 0 }
  0x8f   :  { %v119_v27 = vshrl.u32 %v118_v25, 23  ;;  %v122_v33 = vand.u32 8388607, %v115_v30  ;;  %vm1235_vm0 = vcmp.le.f32.partialorder %v115_v30, 0.7853982 }
  0x91   :  { %v733_v28 = vadd.s32 4294967169, %v119_v27  ;;  %v123_v38 = vor.u32 8388608, %v122_v33 }
  0x93   :  { %v125_v31 = vadd.s32 1, %v733_v28  ;;  %v1192_v59 = vshll.u32 %v123_v38, 8 }
  0x95   :  { %vm126_vm3 = vcmp.gt.s32.totalorder %v125_v31, 0  ;;  %v164_v8 = vand.u32 65535, %v1192_v59  ;;  %v165_v10 = vshrl.u32 %v1192_v59, 16 }
  0x96   :  { %v127_v34 = vsel %vm126_vm3, %v125_v31, 0 }
  0x97   :  { %v129_v35 = vand.u32 31, %v127_v34  ;;  %v1185_v39 = vshrl.u32 %v127_v34, 5 }
  0x99   :  { %v1183_v36 = vsub.s32 32, %v129_v35  ;;  %v141_v41 = vshll.u32 %v1123_v40, %v129_v35  ;;  %v144_v43 = vshll.u32 %v1124_v42, %v129_v35  ;;  %v132_v48 = vshll.u32 %v1126_v47, %v129_v35 }
  0x9a   :  { %v135_v51 = vshll.u32 %v1127_v49, %v129_v35  ;;  %v138_v54 = vshll.u32 %v1128_v52, %v129_v35  ;;  %vm150_vm4 = vcmp.lt.s32.totalorder %v1185_v39, 4  ;;  %vm147_vm5 = vcmp.lt.s32.totalorder %v1185_v39, 1 }
  0x9b   :  { %v142_v44 = vshrl.u32 %v1124_v42, %v1183_v36  ;;  %v145_v46 = vshrl.u32 %v1125_v45, %v1183_v36  ;;  %v133_v50 = vshrl.u32 %v1127_v49, %v1183_v36  ;;  %v136_v53 = vshrl.u32 %v1128_v52, %v1183_v36 }
  0x9c   :  { %v139_v55 = vshrl.u32 %v1123_v40, %v1183_v36  ;;  %vm149_vm6 = vcmp.lt.s32.totalorder %v1185_v39, 3  ;;  %vm148_vm7 = vcmp.lt.s32.totalorder %v1185_v39, 2  ;;  %v131_v37 = vshrl.u32 %v1126_v47, %v1183_v36 }
  0x9d   :  { %v143_v56 = vor.u32 %v142_v44, %v141_v41  ;;  %v146_v57 = vor.u32 %v145_v46, %v144_v43  ;;  %v134_v58 = vor.u32 %v133_v50, %v132_v48  ;;  %v137_v60 = vor.u32 %v136_v53, %v135_v51 }
  0x9e   :  { %v140_v61 = vor.u32 %v139_v55, %v138_v54 }
  0x9f   :  { %v156_v62 = vsel %vm150_vm4, %v143_v56, 920167782  ;;  %v160_v63 = vsel %vm150_vm4, %v146_v57, 1326507024  ;;  %v155_v2 = vsel %vm147_vm5, %v134_v58, %v137_v60  ;;  %v151_v44 = vsel %vm147_vm5, %v131_v37, %v134_v58 }
  0xa0   :  { %v157_v3 = vsel %vm149_vm6, %v140_v61, %v156_v62  ;;  %v159_v4 = vsel %vm147_vm5, %v137_v60, %v140_v61  ;;  %v161_v7 = vsel %vm149_vm6, %v143_v56, %v160_v63  ;;  %v152_v33 = vsel %vm150_vm4, %v140_v61, 2102212464 }
  0xa1   :  { %v158_v5 = vsel %vm148_vm7, %v155_v2, %v157_v3  ;;  %v162_v9 = vsel %vm148_vm7, %v159_v4, %v161_v7  ;;  %v153_v45 = vsel %vm149_vm6, %v137_v60, %v152_v33  ;;  %v908_v33 = vld [vmem:[#allocation7 + $0x60] sm:$0xff]  ;;  %vm258_vm4 = vweird.f32 %v1177_v24 }
  0xa2   :  { %v188_v11 = vand.u32 65535, %v158_v5  ;;  %v189_v12 = vshrl.u32 %v158_v5, 16  ;;  %v166_v13 = vand.u32 65535, %v162_v9  ;;  %v167_v14 = vshrl.u32 %v162_v9, 16 }
  0xa3   :  { %v154_v47 = vsel %vm148_vm7, %v151_v44, %v153_v45  ;;  %vm89_vm5 = vweird.f32 %v1173_v6 }
  0xa4   :  { %v191_v15 = vmul.u32 %v189_v12, %v164_v8  ;;  %v192_v16 = vmul.u32 %v188_v11, %v165_v10  ;;  %v169_v17 = vmul.u32 %v167_v14, %v164_v8  ;;  %v170_v18 = vmul.u32 %v166_v13, %v165_v10 }
  0xa5   :  { %v190_v19 = vmul.u32 %v188_v11, %v164_v8  ;;  %v168_v21 = vmul.u32 %v166_v13, %v164_v8  ;;  %v193_v25 = vmul.u32 %v189_v12, %v165_v10  ;;  %v171_v26 = vmul.u32 %v167_v14, %v165_v10 }
  0xa6   :  { %v194_v20 = vshll.u32 %v191_v15, 16  ;;  %v172_v22 = vshll.u32 %v169_v17, 16  ;;  %v196_v27 = vshll.u32 %v192_v16, 16  ;;  %v174_v29 = vshll.u32 %v170_v18, 16 }
  0xa7   :  { %v195_v42 = vshrl.u32 %v191_v15, 16  ;;  %v173_v46 = vshrl.u32 %v169_v17, 16  ;;  %v197_v49 = vshrl.u32 %v192_v16, 16  ;;  %v175_v51 = vshrl.u32 %v170_v18, 16  ;;  %v911_v16 = vld [vmem:[#allocation7 + $0x78] sm:$0xff] }
  0xa8   :  { %vm198_vm8 = vc.u32 %v190_v19, %v194_v20  ;;  %v200_v28 = vadd.s32 %v194_v20, %v190_v19  ;;  %vm176_vm9 = vc.u32 %v168_v21, %v172_v22  ;;  %v178_v31 = vadd.s32 %v172_v22, %v168_v21  ;;  %446 = vmatpush.bf16.msra.mxu1 %v911_v16  ;;  %v910_v22 = vld [vmem:[#allocation7 + $0x70] sm:$0xff] }
  0xa9   :  { %v199_v32 = vsel %vm198_vm8, 1, %v1122_v23  ;;  %v177_v34 = vsel %vm176_vm9, 1, %v1122_v23  ;;  %v208_v55 = vmul.u32 %v1192_v59, %v154_v47  ;;  %v1129_v21 = vmov 1   ;;  %v914_v16 = vld [vmem:[#allocation7 + $0x90] sm:$0xff] }
  0xaa   :  { %v201_v35 = vadd.s32 %v199_v32, %v193_v25  ;;  %vm202_vm10 = vc.u32 %v200_v28, %v196_v27  ;;  %v179_v38 = vadd.s32 %v177_v34, %v171_v26  ;;  %vm180_vm11 = vc.u32 %v178_v31, %v174_v29  ;;  %v352_v14 = vpop.permute.xlu0 %351  ;;  %v365_v15 = vpop.permute.xlu1 %364  ;;  %958 = vset.pattern.permute.xlu2 %v1129_v21  ;;  %v925_v21 = vld [vmem:[#allocation7 + $0xe8] sm:$0xff] }
  0xab   :  { %v203_v40 = vsel %vm202_vm10, 1, %v1122_v23  ;;  %v181_v41 = vsel %vm180_vm11, 1, %v1122_v23  ;;  %v204_v23 = vadd.s32 %v200_v28, %v196_v27  ;;  %v354_v19 = vmul.f32 %v352_v14, %v1169_v1  ;;  %v909_v27 = vld [vmem:[#allocation7 + $0x68] sm:$0xff] }
  0xac   :  { %v205_v43 = vadd.s32 %v203_v40, %v201_v35  ;;  %v183_v48 = vadd.s32 %v181_v41, %v179_v38  ;;  %v367_v20 = vmul.f32 %v365_v15, %v1169_v1  ;;  %447 = vmatpush.bf16.msra.mxu1 %v910_v22  ;;  %v924_v22 = vld [vmem:[#allocation7 + $0xe0] sm:$0xff]  ;;  %vm711_vm8 = vcmask 64512  }
  0xad   :  { %358 = vperm.xlu1 %957, %v354_v19   ;;  %v927_v19 = vld [vmem:[#allocation7 + $0xf8] sm:$0xff] }
  0xae   :  { %v206_v50 = vadd.s32 %v205_v43, %v195_v42  ;;  %v184_v36 = vadd.s32 %v183_v48, %v173_v46  ;;  %371 = vperm.xlu2 %958, %v367_v20   ;;  %610 = vmatpush.bf16.msra.mxu3 %v927_v19  ;;  %v926_v20 = vld [vmem:[#allocation7 + $0xf0] sm:$0xff] }
  0xb0   :  { %v207_v52 = vadd.s32 %v206_v50, %v197_v49  ;;  %v185_v53 = vadd.s32 %v184_v36, %v175_v51  ;;  %448 = vmatpush.bf16.msra.mxu1 %v909_v27 }
  0xb2   :  { %v211_v54 = vadd.s32 1, %v207_v52  ;;  %vm210_vm12 = vc.u32 %v185_v53, %v204_v23  ;;  %v209_v5 = vadd.s32 %v204_v23, %v185_v53  ;;  %611 = vmatpush.bf16.msra.mxu3 %v926_v20 }
  0xb4   :  { %v212_v56 = vsel %vm210_vm12, %v211_v54, %v207_v52  ;;  %449 = vmatpush.bf16.msra.mxu1 %v908_v33  ;;  %v921_v33 = vld [vmem:[#allocation7 + $0xc8] sm:$0xff] }
  0xb5   :  { %v213_v57 = vadd.s32 %v212_v56, %v208_v55  ;;  %v907_v56 = vld [vmem:[#allocation7 + $0x58] sm:$0xff] }
  0xb6   :  { %959 = vset.pattern.permute.xlu2 %v1119_v0  ;;  %612 = vmatpush.bf16.msra.mxu3 %v925_v21 }
  0xb7   :  { %v214_v58 = vadd.s32 536870912, %v213_v57 }
  0xb8   :  { %450 = vmatpush.bf16.msra.mxu1 %v907_v56 }
  0xb9   :  { %v215_v60 = vshrl.u32 %v214_v58, 30  ;;  %v905_v58 = vld [vmem:[#allocation7 + $0x48] sm:$0xff] }
  0xba   :  { %613 = vmatpush.bf16.msra.mxu3 %v924_v22 }
  0xbb   :  { %v216_v61 = vshll.u32 %v215_v60, 30  ;;  %v239_v1 = vsub.s32 4, %v215_v60 }
  0xbd   :  { %v217_v62 = vsub.s32 %v213_v57, %v216_v61  ;;  %v240_v37 = vsel %vm117_vm15, %v239_v1, %v215_v60  ;;  %v906_v57 = vld [vmem:[#allocation7 + $0x50] sm:$0xff]  ;;  %v904_v60 = vld [vmem:[#allocation7 + $0x40] sm:$0xff]  ;;  %v919_v61 = vld [vmem:[#allocation7 + $0xb8] sm:$0xff] }
  0xbe   :  { %v242_v30 = vsel %vm1235_vm0, 0, %v240_v37  ;;  %451 = vmatpush.bf16.msra.mxu1 %v906_v57  ;;  %528 = vmatpush.bf16.msra.mxu2 %v919_v61  ;;  %v934_v37 = vld [vmem:[#allocation7 + $0x130] sm:$0xff]  ;;  %v968_v61 = vld [vmem:[#allocation8 + $0x4] ss:$0 sm:$0xff] }
  0xbf   :  { %vm218_vm13 = vcmp.lt.s32.totalorder %v217_v62, 0  ;;  %v219_v63 = vsub.s32 0, %v217_v62  ;;  %v259_v45 = vadd.s32 3, %v242_v30  ;;  %v931_v30 = vld [vmem:[#allocation7 + $0x118] sm:$0xff] }
  0xc1   :  { %v220_v2 = vsel %vm218_vm13, %v219_v63, %v217_v62  ;;  %v260_v51 = vand.u32 3, %v259_v45  ;;  %v917_v63 = vld [vmem:[#allocation7 + $0xa8] sm:$0xff] }
  0xc2   :  { %v221_v3 = vclz %v220_v2  ;;  %452 = vmatpush.bf16.msra.mxu1 %v905_v58  ;;  %v916_v2 = vld [vmem:[#allocation7 + $0xa0] sm:$0xff] }
  0xc3   :  { %vm262_vm1 = vcmp.eq.s32.totalorder %v260_v51, 0  ;;  %vm265_vm2 = vcmp.eq.s32.totalorder %v260_v51, 2  ;;  %vm261_vm3 = vcmp.lt.s32.totalorder %v260_v51, 2  ;;  %v928_v51 = vld [vmem:[#allocation7 + $0x100] sm:$0xff] }
  0xc4   :  { %v734_v4 = vadd.s32 4294967294, %v221_v3 }
  0xc6   :  { %vm735_vm14 = vcmp.lt.s32.totalorder %v734_v4, 0  ;;  %453 = vmatpush.bf16.msra.mxu1 %v904_v60 }
  0xc7   :  { %v224_v39 = vsel %vm735_vm14, 0, %v734_v4  ;;  %v962_v4 = vld [vmem:[#allocation8] ss:$0 sm:$0xff] }
  0xc8   :  { %v225_v7 = vsub.s32 32, %v224_v39  ;;  %v229_v8 = vsub.s32 4294967266, %v224_v39  ;;  %v226_v9 = vshll.u32 %v217_v62, %v224_v39  ;;  %v918_v62 = vld [vmem:[#allocation7 + $0xb0] sm:$0xff]  ;;  %v964_v39 = vld [vmem:[#allocation5 + $0x9] ss:$0 sm:$0xff] }
  0xc9   :  { %529 = vmatpush.bf16.msra.mxu2 %v918_v62 }
  0xca   :  { %v227_v10 = vshrl.u32 %v209_v5, %v225_v7  ;;  %v230_v59 = vadd.s32 127, %v229_v8  ;;  %v915_v7 = vld [vmem:[#allocation7 + $0x98] sm:$0xff] }
  0xcc   :  { %v228_v11 = vor.u32 %v227_v10, %v226_v9  ;;  %v231_v12 = vshll.u32 %v230_v59, 23 }
  0xcd   :  { %530 = vmatpush.bf16.msra.mxu2 %v917_v63 }
  0xce   :  { %v232_v13 = vor.u32 4788187, %v231_v12  ;;  %v235_v18 = vcvt.s32.f32 %v228_v11 }
  0xd0   :  { %v233_v17 = vand.u32 2147483647, %v232_v13 }
  0xd1   :  { %531 = vmatpush.bf16.msra.mxu2 %v916_v2 }
  0xd2   :  { %v236_v25 = vmul.f32 %v235_v18, %v233_v17  ;;  %v913_v17 = vld [vmem:[#allocation7 + $0x88] sm:$0xff]  ;;  %v912_v18 = vld [vmem:[#allocation7 + $0x80] sm:$0xff] }
  0xd4   :  { %v237_v26 = vxor.u32 2147483648, %v236_v25 }
  0xd5   :  { %532 = vmatpush.bf16.msra.mxu2 %v915_v7 }
  0xd6   :  { %v238_v29 = vsel %vm117_vm15, %v237_v26, %v236_v25  ;;  %v923_v25 = vld [vmem:[#allocation7 + $0xd8] sm:$0xff]  ;;  %v965_v26 = vld [vmem:[#allocation8 + $0x1] ss:$0 sm:$0xff] }
  0xd7   :  { %v241_v31 = vsel %vm1235_vm0, %v1177_v24, %v238_v29  ;;  %v963_v24 = vld [vmem:[#allocation5 + $0x8] ss:$0 sm:$0xff]  ;;  %614 = vmatpush.bf16.msra.mxu3 %v923_v25 }
  0xd8   :  { %v243_v32 = vmul.f32 %v241_v31, %v241_v31 }
  0xd9   :  { %533 = vmatpush.bf16.msra.mxu2 %v914_v16 }
  0xda   :  { %v244_v34 = vmul.f32 -0.001358992, %v243_v32  ;;  %v251_v35 = vmul.f32 -0.00019511016, %v243_v32 }
  0xdc   :  { %v245_v38 = vadd.f32 0.041655596, %v244_v34  ;;  %v252_v40 = vadd.f32 0.008332121, %v251_v35  ;;  %v920_v34 = vld [vmem:[#allocation7 + $0xc0] sm:$0xff]  ;;  %v935_v35 = vld [vmem:[#allocation7 + $0x138] sm:$0xff] }
  0xdd   :  { %534 = vmatpush.bf16.msra.mxu2 %v913_v17  ;;  %692 = vmatpush.bf16.msrb.mxu0 %v935_v35 }
  0xde   :  { %v246_v41 = vmul.f32 %v245_v38, %v243_v32  ;;  %v253_v42 = vmul.f32 %v252_v40, %v243_v32  ;;  %v933_v38 = vld [vmem:[#allocation7 + $0x128] sm:$0xff]  ;;  %v932_v40 = vld [vmem:[#allocation7 + $0x120] sm:$0xff] }
  0xe0   :  { %v247_v43 = vadd.f32 -0.4999988, %v246_v41  ;;  %v254_v44 = vadd.f32 -0.16666654, %v253_v42  ;;  %v966_v41 = vld [vmem:[#allocation8 + $0x2] ss:$0 sm:$0xff] }
  0xe1   :  { %535 = vmatpush.bf16.msra.mxu2 %v912_v18  ;;  %693 = vmatpush.bf16.msrb.mxu0 %v934_v37 }
  0xe2   :  { %v248_v46 = vmul.f32 %v247_v43, %v243_v32  ;;  %v255_v48 = vmul.f32 %v254_v44, %v243_v32  ;;  %v922_v32 = vld [vmem:[#allocation7 + $0xd0] sm:$0xff] }
  0xe3   :  { %615 = vmatpush.bf16.msra.mxu3 %v922_v32 }
  0xe4   :  { %v249_v49 = vadd.f32 1.0, %v248_v46  ;;  %v256_v50 = vadd.f32 1.0, %v255_v48  ;;  %v930_v48 = vld [vmem:[#allocation7 + $0x110] sm:$0xff] }
  0xe5   :  { %694 = vmatpush.bf16.msrb.mxu0 %v933_v38 }
  0xe6   :  { %v257_v36 = vmul.f32 %v256_v50, %v241_v31  ;;  %v266_v47 = vxor.u32 2147483648, %v249_v49 }
  0xe7   :  { %616 = vmatpush.bf16.msra.mxu3 %v921_v33 }
  0xe8   :  { %v263_v0 = vxor.u32 2147483648, %v257_v36  ;;  %v267_v53 = vsel %vm265_vm2, %v266_v47, %v257_v36 }
  0xe9   :  { %695 = vmatpush.bf16.msrb.mxu0 %v932_v40 }
  0xea   :  { %v264_v52 = vsel %vm262_vm1, %v249_v49, %v263_v0  ;;  %v929_v49 = vld [vmem:[#allocation7 + $0x108] sm:$0xff] }
  0xeb   :  { %v268_v23 = vsel %vm261_vm3, %v264_v52, %v267_v53  ;;  %617 = vmatpush.bf16.msra.mxu3 %v920_v34 }
  0xec   :  { %v269_v54 = vsel %vm258_vm4, nan, %v268_v23 }
  0xed   :  { %v270_v55 = vpack.c.bf16 %v269_v54, %v269_v54  ;;  %696 = vmatpush.bf16.msrb.mxu0 %v931_v30  ;;  %v967_v54 = vld [vmem:[#allocation8 + $0x3] ss:$0 sm:$0xff] }
  0xef   :  { %345 = vmatmul.bf16.vlgmr.msra.gmra.mxu0 %v270_v55 }
  0xf1   :  { %697 = vmatpush.bf16.msrb.mxu0 %v930_v48 }
  0xf5   :  { %698 = vmatpush.bf16.msrb.mxu0 %v929_v49 }
  0xf9   :  { %699 = vmatpush.bf16.msrb.mxu0 %v928_v51 }
 0x108   :  { %v372_v5 = vpop.permute.xlu2 %371 }
 0x109   :  { %v375_v59 = vmul.f32 %v964_v39, %v372_v5 }
 0x11f   :  { %v359_v3 = vpop.permute.xlu1 %358 }
 0x120   :  { %v362_v8 = vmul.f32 %v963_v24, %v359_v3 }
 0x16c   :  { %v346_v9 = vpop.f32.mrf.mxu0 }
 0x16d   :  { %v347_v10 = vadd.f32 %v962_v4, %v346_v9 }
 0x16f   :  { %v363_v11 = vadd.f32 %v362_v8, %v347_v10 }
 0x171   :  { %v376_v12 = vadd.f32 %v375_v59, %v363_v11 }
 0x173   :  { %973 = vtanh.f32 %v376_v12 }
 0x174   :  { %v348_v13 = vpop.f32.mrf.mxu0 }
 0x179   :  { %v974_v14 = vpop.eup %973 }
 0x17a   :  { %v378_v15 = vpack.c.bf16 %v974_v14, %v974_v14 }
 0x17c   :  { %454 = vmatmul.bf16.vlgmr.msra.gmra.mxu1 %v378_v15 }
 0x1f9   :  { %v455_v27 = vpop.f32.mrf.mxu1 }
 0x1fa   :  { %v456_v28 = vadd.f32 %v965_v26, %v455_v27 }
 0x1fc   :  { %975 = vtanh.f32 %v456_v28 }
 0x201   :  { %v457_v29 = vpop.f32.mrf.mxu1 }
 0x202   :  { %v976_v1 = vpop.eup %975 }
 0x203   :  { %v460_v31 = vpack.c.bf16 %v976_v1, %v976_v1 }
 0x205   :  { %536 = vmatmul.bf16.vlgmr.msra.gmra.mxu2 %v460_v31 }
 0x288   :  { %v537_v42 = vpop.f32.mrf.mxu2 }
 0x289   :  { %v538_v43 = vadd.f32 %v966_v41, %v537_v42 }
 0x28b   :  { %977 = vtanh.f32 %v538_v43 }
 0x28c   :  { %979 = vrsqrt.f32 %v1173_v6 }
 0x290   :  { %v539_v44 = vpop.f32.mrf.mxu2 }
 0x291   :  { %v978_v45 = vpop.eup %977 }
 0x292   :  { %v542_v46 = vpack.c.bf16 %v978_v45, %v978_v45  ;;  %v980_v50 = vpop.eup %979 }
 0x293   :  { %v84_v36 = vmul.f32 %v980_v50, %v1173_v6  ;;  %vm90_vm6 = vweird.f32 %v980_v50 }
 0x294   :  { %618 = vmatmul.bf16.vlgmr.msra.gmra.mxu3 %v542_v46  ;;  %vm91_vm7 = vmor %vm89_vm5, %vm90_vm6 }
 0x295   :  { %v85_v47 = vmul.f32 %v980_v50, %v84_v36 }
 0x297   :  { %v86_v0 = vmul.f32 0.5, %v85_v47 }
 0x299   :  { %v87_v52 = vsub.f32 1.5, %v86_v0 }
 0x29b   :  { %v88_v53 = vmul.f32 %v980_v50, %v87_v52 }
 0x29d   :  { %v92_v23 = vsel %vm91_vm7, %v980_v50, %v88_v53 }
 0x29e   :  { %707 = vperm.xlu2 %959, %v92_v23  }
 0x2f8   :  { %v708_v63 = vpop.permute.xlu2 %707 }
 0x317   :  { %v619_v55 = vpop.f32.mrf.mxu3 }
 0x318   :  { %v620_v56 = vadd.f32 %v967_v54, %v619_v55 }
 0x31a   :  { %981 = vtanh.f32 %v620_v56 }
 0x31f   :  { %v621_v57 = vpop.f32.mrf.mxu3 }
 0x320   :  { %v982_v58 = vpop.eup %981 }
 0x321   :  { %v624_v60 = vpack.c.bf16 %v982_v58, %v982_v58 }
 0x323   :  { %700 = vmatmul.bf16.vlgmr.msrb.gmra.mxu0 %v624_v60 }
 0x3a0   :  { %v701_v62 = vpop.f32.mrf.mxu0 }
 0x3a1   :  { %v702_v6 = vadd.f32 %v968_v61, %v701_v62 }
 0x3a3   :  { %v710_v2 = vmul.f32 %v708_v63, %v702_v6 }
 0x3a5   :  { %712 = vst.msk [vmem:[#allocation10] sm:$0xff] %vm711_vm8, %v710_v2 }
 0x3a6   :  { %723 = dma.vmem_to_hbm [thread:$0]  %s719_s12, 128, %s721_s15, [#allocation4]  }
 0x3a8   :  { %v703_v24 = vpop.f32.mrf.mxu0 }
 0x3a9   :  { %1109 = dma.done.wait [#allocation4], 128  }
 0x3aa   :  { %1110 = vsyncadd [#allocation4], 4294967168 }
 0x3ab   :  { %728 = vsyncpa [#allocation3], 1 }
 0x3ac   :  { %729 = vsyncpa [#allocation6], 1 }
 0x3ad   :  { %730 = vsyncpa [#allocation9], 1 }
 0x3ae   :  { %731 = vsyncpa [#allocation4], 1 }

</bundles_post_ra>
